<compile_context>
chip_gen: v7x
topology: tpu7x:2x2x1
jax: 0.10.0
libtpu: 0.0.40
codegen_flags: <defaults>
</compile_context>

<pallas_src>
import functools

import jax
import jax.numpy as jnp
from jax.experimental import pallas as pl
from jax.experimental.pallas import tpu as pltpu


def _round_up(x, m):
    return (x + m - 1) // m * m


def gin_edge_kernel(a_ref, e_ref, hk_ref, hres_ref, w1_ref, b1_ref, w2_ref,
                    b2_ref, gamma_ref, beta_ref, out_ref, acc_ref, *,
                    n_u, u_tile):
    """Grid = (node tile i, neighbour tile j); j is the reduction axis."""
    j = pl.program_id(1)
    nj = pl.num_programs(1)

    # ---- neighbour aggregation A @ H on the MXU (bf16 in, f32 accumulate).
    # j == 0 writes the accumulator directly (no zero-fill pass).
    neigh = jnp.dot(a_ref[...], hk_ref[...], preferred_element_type=jnp.float32)

    @pl.when(j == 0)
    def _():
        acc_ref[...] = neigh

    @pl.when(j > 0)
    def _():
        acc_ref[...] += neigh

    # ---- edge-feature sum over this neighbour tile, accumulated straight into
    # the scratch in 128-neighbour chunks (bounds vreg live ranges; E is native
    # f32 so there is no convert and no full-tile temporary).
    chunk_rows = 128
    n_chunks = u_tile // chunk_rows

    def accumulate(masked):
        for c in range(n_chunks):
            chunk = e_ref[:, c * chunk_rows:(c + 1) * chunk_rows, :]
            if masked:
                u_ids = jax.lax.broadcasted_iota(jnp.int32, (1, chunk_rows, 1), 1)
                u_ids = u_ids + (j * u_tile + c * chunk_rows)
                chunk = jnp.where(u_ids < n_u, chunk, 0.0)
            acc_ref[...] += jnp.sum(chunk, axis=1, dtype=jnp.float32)

    if n_u % u_tile == 0:
        accumulate(masked=False)                 # no ragged tail -> never mask
    else:
        @pl.when(j < nj - 1)
        def _():
            accumulate(masked=False)

        @pl.when(j == nj - 1)                    # ragged last tile: mask the
        def _():                                 # out-of-bounds garbage rows
            accumulate(masked=True)

    # ---- epilogue: MLP + residual + LayerNorm, once per node tile.
    @pl.when(j == nj - 1)
    def _():
        u = acc_ref[...]                                              # (TV, D) f32
        hid = jnp.dot(u.astype(jnp.bfloat16), w1_ref[...],
                      preferred_element_type=jnp.float32) + b1_ref[...]
        hid = jnp.maximum(hid, 0.0)
        mlp = jnp.dot(hid.astype(jnp.bfloat16), w2_ref[...],
                      preferred_element_type=jnp.float32) + b2_ref[...]
        res = mlp + hres_ref[...]                                     # residual in f32
        mean = jnp.mean(res, axis=-1, keepdims=True)
        cen = res - mean
        var = jnp.mean(cen * cen, axis=-1, keepdims=True)
        normed = cen * jax.lax.rsqrt(var + 1e-5)
        out_ref[...] = (normed * gamma_ref[...] + beta_ref[...]).astype(out_ref.dtype)


def _pick_tiles(n, d, tv, tu):
    """Generation-aware tile selection: VMEM capacity drives the E buffer size."""
    try:
        vmem_cap = pltpu.get_tpu_info().vmem_capacity_bytes
    except Exception:
        vmem_cap = 64 * 1024 * 1024          # be conservative if the query fails
    big_vmem = vmem_cap >= 96 * 1024 * 1024  # v5e/v6e: 128 MiB; v7x: 64 MiB

    d_lanes = _round_up(d, 128)              # E tile is lane-padded once in VMEM
    e_buf_target = (16 if big_vmem else 6) * 1024 * 1024   # per E buffer

    if tv is None:
        tv = min(128, _round_up(n, 8))
        if (not big_vmem) and n > 8 and pl.cdiv(n, tv) < 2:
            # dual-TensorCore parts (v7x): ensure >= 2 tiles on the parallel axis.
            tv = _round_up(pl.cdiv(n, 2), 8)
        # very wide features: shrink the node tile rather than blow the budget
        # even at the minimum neighbour tile (TU = 128).
        while tv > 8 and tv * 128 * d_lanes * 4 > 2 * e_buf_target:
            tv = _round_up(tv // 2, 8)
    tv = _round_up(tv, 8)

    if tu is None:
        tu = max(128, e_buf_target // (tv * d_lanes * 4) // 128 * 128)
    tu = min(max(128, _round_up(tu, 128)), _round_up(n, 128))

    vmem_limit = (100 if big_vmem else 48) * 1024 * 1024
    return tv, tu, vmem_limit


def graph_isomorphism_edge(adj, h, e_dense, w1, b1, w2, b2, gamma, beta,
                           *, tv=None, tu=None):
    """Pallas GIN-edge layer (training=False path). Weights are (in_dim, out_dim)."""
    N, D = h.shape
    H4 = w1.shape[1]
    f32, bf16 = jnp.float32, jnp.bfloat16

    TV, TU, vmem_limit = _pick_tiles(N, D, tv, tu)
    Npv = _round_up(N, TV)
    Npu = _round_up(N, TU)
    Hp = _round_up(H4, 128)
    grid = (Npv // TV, Npu // TU)

    # Only the cheap O(N*D) / O(N^2) operands are padded or cast on the host.
    a_p = jnp.zeros((Npv, Npu), bf16).at[:N, :N].set(adj.astype(bf16))   # 0/1 exact
    hk_p = jnp.zeros((Npu, D), bf16).at[:N, :].set(h.astype(bf16))       # matmul side
    hres_p = jnp.zeros((Npv, D), f32).at[:N, :].set(h.astype(f32))       # residual side
    w1_p = jnp.zeros((D, Hp), bf16).at[:, :H4].set(w1.astype(bf16))
    b1_p = jnp.zeros((1, Hp), f32).at[:, :H4].set(b1.reshape(1, H4).astype(f32))
    w2_p = jnp.zeros((Hp, D), bf16).at[:H4, :].set(w2.astype(bf16))
    b2_p = b2.reshape(1, D).astype(f32)
    g_p = gamma.reshape(1, D).astype(f32)
    be_p = beta.reshape(1, D).astype(f32)

    # The dominant E stream is passed through untouched (single f32 HBM read).
    # Only graphs smaller than one tile get a tiny zero-pad so no block exceeds
    # the array extent; the ragged neighbour tail is otherwise masked in-kernel.
    ne_v = N if N >= TV else TV
    ne_u = N if N >= TU else TU
    if (ne_v, ne_u) == (N, N):
        e_p = e_dense.astype(f32)                     # no-op when already f32
    else:
        e_p = jnp.zeros((ne_v, ne_u, D), f32).at[:N, :N, :].set(e_dense.astype(f32))
    n_u = ne_u

    kernel = functools.partial(gin_edge_kernel, n_u=n_u, u_tile=TU)

    out = pl.pallas_call(
        kernel,
        out_shape=jax.ShapeDtypeStruct((Npv, D), f32),
        grid_spec=pltpu.PrefetchScalarGridSpec(
            num_scalar_prefetch=0,
            grid=grid,
            in_specs=[
                pl.BlockSpec((TV, TU), lambda i, j: (i, j)),          # A tile
                pl.BlockSpec((TV, TU, D), lambda i, j: (i, j, 0)),    # E tile (dominant, f32, unpadded D)
                pl.BlockSpec((TU, D), lambda i, j: (j, 0)),           # H, matmul side
                pl.BlockSpec((TV, D), lambda i, j: (i, 0)),           # H, residual side
                pl.BlockSpec((D, Hp), lambda i, j: (0, 0)),           # W1 (resident, bf16)
                pl.BlockSpec((1, Hp), lambda i, j: (0, 0)),           # b1
                pl.BlockSpec((Hp, D), lambda i, j: (0, 0)),           # W2 (resident, bf16)
                pl.BlockSpec((1, D), lambda i, j: (0, 0)),            # b2
                pl.BlockSpec((1, D), lambda i, j: (0, 0)),            # gamma
                pl.BlockSpec((1, D), lambda i, j: (0, 0)),            # beta
            ],
            out_specs=pl.BlockSpec((TV, D), lambda i, j: (i, 0)),
            scratch_shapes=[pltpu.VMEM((TV, D), jnp.float32)],        # f32 accumulator
        ),
        compiler_params=pltpu.CompilerParams(
            dimension_semantics=("parallel", "arbitrary"),
            vmem_limit_bytes=vmem_limit,
        ),
    )(a_p, e_p, hk_p, hres_p, w1_p, b1_p, w2_p, b2_p, g_p, be_p)

    return out[:N]


def reference(adj, h, e_dense, w1, b1, w2, b2, gamma, beta):
    """Pure-JAX reference mirroring the kernel's bf16 quantization (A/H-matmul side
    and MLP weights in bf16, f32 accumulation; E kept in full f32)."""
    f32, bf16 = jnp.float32, jnp.bfloat16
    neigh = jnp.dot(adj.astype(bf16), h.astype(bf16), preferred_element_type=f32)
    e_agg = jnp.sum(e_dense.astype(f32), axis=1)
    u = neigh + e_agg
    hid = jnp.dot(u.astype(bf16), w1.astype(bf16), preferred_element_type=f32) + b1
    hid = jnp.maximum(hid, 0.0)
    res = jnp.dot(hid.astype(bf16), w2.astype(bf16), preferred_element_type=f32) + b2 + h
    mean = jnp.mean(res, axis=-1, keepdims=True)
    var = jnp.mean((res - mean) ** 2, axis=-1, keepdims=True)
    return (res - mean) * jax.lax.rsqrt(var + 1e-5) * gamma + beta


def _make_inputs(key, N, D):
    H4 = 4 * D
    keys = jax.random.split(key, 9)
    h = jax.random.normal(keys[0], (N, D), dtype=jnp.float32)
    adj = (jax.random.uniform(keys[1], (N, N)) < 0.4).astype(jnp.float32)
    adj = adj * (1.0 - jnp.eye(N, dtype=jnp.float32))
    e_dense = jax.random.normal(keys[2], (N, N, D), dtype=jnp.float32) * adj[:, :, None]
    w1 = jax.random.normal(keys[3], (D, H4), dtype=jnp.float32) * 0.1
    b1 = jax.random.normal(keys[4], (1, H4), dtype=jnp.float32) * 0.1
    w2 = jax.random.normal(keys[5], (H4, D), dtype=jnp.float32) * 0.1
    b2 = jax.random.normal(keys[6], (1, D), dtype=jnp.float32) * 0.1
    gamma = 1.0 + 0.1 * jax.random.normal(keys[7], (1, D), dtype=jnp.float32)
    beta = 0.1 * jax.random.normal(keys[8], (1, D), dtype=jnp.float32)
    return adj, h, e_dense, w1, b1, w2, b2, gamma, beta


if __name__ == "__main__":
    key = jax.random.PRNGKey(0)
    k1, k2, k3 = jax.random.split(key, 3)

    # Case 1: tiny graph (typical module usage) -> single tile, padded-E path.
    args = _make_inputs(k1, N=8, D=32)
    out = jax.block_until_ready(graph_isomorphism_edge(*args))
    ref = reference(*args)
    assert out.shape == (8, 32)
    assert jnp.allclose(out, ref, atol=2e-3, rtol=2e-3), "small-case mismatch"

    # Case 2: larger graph with the generation-aware (heuristic) tiling.
    args = _make_inputs(k2, N=256, D=64)
    out = jax.block_until_ready(graph_isomorphism_edge(*args))
    ref = reference(*args)
    assert out.shape == (256, 64)
    assert jnp.allclose(out, ref, atol=2e-3, rtol=2e-3), "tiled-case mismatch"

    # Case 3: forced multi-tile grid with ragged node AND neighbour tails
    # (exercises the j-accumulation path and the in-kernel edge mask on any TPU).
    args = _make_inputs(k3, N=200, D=64)
    out = jax.block_until_ready(graph_isomorphism_edge(*args, tv=64, tu=128))
    ref = reference(*args)
    assert out.shape == (200, 64)
    assert jnp.allclose(out, ref, atol=2e-3, rtol=2e-3), "ragged-case mismatch"

    print("KERNEL_OK")
</pallas_src>

<mosaic_0001>
module attributes {stable_mosaic.version = 11 : i64} {
  func.func @gin_edge_kernel(%arg0: i32, %arg1: i32, %arg2: memref<8x128xbf16, #tpu.memory_space<vmem>>, %arg3: memref<8x128x32xf32, #tpu.memory_space<vmem>>, %arg4: memref<128x32xbf16, #tpu.memory_space<vmem>>, %arg5: memref<8x32xf32, #tpu.memory_space<vmem>>, %arg6: memref<32x128xbf16, #tpu.memory_space<vmem>>, %arg7: memref<1x128xf32, #tpu.memory_space<vmem>>, %arg8: memref<128x32xbf16, #tpu.memory_space<vmem>>, %arg9: memref<1x32xf32, #tpu.memory_space<vmem>>, %arg10: memref<1x32xf32, #tpu.memory_space<vmem>>, %arg11: memref<1x32xf32, #tpu.memory_space<vmem>>, %arg12: memref<8x32xf32, #tpu.memory_space<vmem>>, %arg13: memref<8x32xf32, #tpu.memory_space<vmem>>) attributes {dimension_semantics = [#tpu.dimension_semantics<parallel>, #tpu.dimension_semantics<arbitrary>], iteration_bounds = array<i64: 1, 1>, scalar_prefetch = 0 : i64, scratch_operands = 1 : i64, tpu.core_type = #tpu.core_type<tc>, window_params = [{transform_indices = @transform_0, window_bounds = array<i64: 8, 128>}, {transform_indices = @transform_1, window_bounds = array<i64: 8, 128, 32>}, {transform_indices = @transform_2, window_bounds = array<i64: 128, 32>}, {transform_indices = @transform_3, window_bounds = array<i64: 8, 32>}, {pipeline_mode = #tpu.pipeline_mode<synchronous>, transform_indices = @transform_4, window_bounds = array<i64: 32, 128>}, {pipeline_mode = #tpu.pipeline_mode<synchronous>, transform_indices = @transform_5, window_bounds = array<i64: 1, 128>}, {pipeline_mode = #tpu.pipeline_mode<synchronous>, transform_indices = @transform_6, window_bounds = array<i64: 128, 32>}, {pipeline_mode = #tpu.pipeline_mode<synchronous>, transform_indices = @transform_7, window_bounds = array<i64: 1, 32>}, {pipeline_mode = #tpu.pipeline_mode<synchronous>, transform_indices = @transform_8, window_bounds = array<i64: 1, 32>}, {pipeline_mode = #tpu.pipeline_mode<synchronous>, transform_indices = @transform_9, window_bounds = array<i64: 1, 32>}, {transform_indices = @transform_10, window_bounds = array<i64: 8, 32>}]} {
    %c0 = arith.constant 0 : index
    %c0_0 = arith.constant 0 : index
    %0 = vector.load %arg2[%c0, %c0_0] : memref<8x128xbf16, #tpu.memory_space<vmem>>, vector<8x128xbf16>
    %c0_1 = arith.constant 0 : index
    %c0_2 = arith.constant 0 : index
    %1 = vector.load %arg4[%c0_1, %c0_2] : memref<128x32xbf16, #tpu.memory_space<vmem>>, vector<128x32xbf16>
    %cst = arith.constant dense<0.000000e+00> : vector<8x32xf32>
    %2 = tpu.matmul %0, %1, %cst {dimension_numbers = #tpu.dot_dimension_numbers<[1], [0], [0], [1], [0, 0, 1, 1], [], []>} : vector<8x128xbf16>, vector<128x32xbf16>, vector<8x32xf32> -> vector<8x32xf32>
    %c0_i32 = arith.constant 0 : i32
    %3 = arith.cmpi eq, %arg1, %c0_i32 : i32
    %4 = arith.extui %3 : i1 to i32
    %c0_i32_3 = arith.constant 0 : i32
    %5 = arith.cmpi ne, %4, %c0_i32_3 : i32
    scf.if %5 {
      %c0_16 = arith.constant 0 : index
      %c0_17 = arith.constant 0 : index
      %17 = vector.load %arg13[%c0_16, %c0_17] : memref<8x32xf32, #tpu.memory_space<vmem>>, vector<8x32xf32>
      tpu.vector_store %arg13[%c0_16, %c0_17], %2 {strides = array<i32>} : memref<8x32xf32, #tpu.memory_space<vmem>>, vector<8x32xf32>,
    } else {
    }
    %c0_i32_4 = arith.constant 0 : i32
    %6 = arith.cmpi sgt, %arg1, %c0_i32_4 : i32
    %7 = arith.extui %6 : i1 to i32
    %c0_i32_5 = arith.constant 0 : i32
    %8 = arith.cmpi ne, %7, %c0_i32_5 : i32
    scf.if %8 {
      %c0_16 = arith.constant 0 : index
      %c0_17 = arith.constant 0 : index
      %17 = vector.load %arg13[%c0_16, %c0_17] : memref<8x32xf32, #tpu.memory_space<vmem>>, vector<8x32xf32>
      %18 = arith.addf %17, %2 : vector<8x32xf32>
      %c0_18 = arith.constant 0 : index
      %c0_19 = arith.constant 0 : index
      %19 = vector.load %arg13[%c0_18, %c0_19] : memref<8x32xf32, #tpu.memory_space<vmem>>, vector<8x32xf32>
      tpu.vector_store %arg13[%c0_18, %c0_19], %18 {strides = array<i32>} : memref<8x32xf32, #tpu.memory_space<vmem>>, vector<8x32xf32>,
    } else {
    }
    %c0_6 = arith.constant 0 : index
    %c0_7 = arith.constant 0 : index
    %c0_8 = arith.constant 0 : index
    %9 = vector.load %arg3[%c0_6, %c0_7, %c0_8] : memref<8x128x32xf32, #tpu.memory_space<vmem>>, vector<8x128x32xf32>
    %c0_9 = arith.constant 0 : index
    %c0_10 = arith.constant 0 : index
    %10 = vector.load %arg13[%c0_9, %c0_10] : memref<8x32xf32, #tpu.memory_space<vmem>>, vector<8x32xf32>
    %cst_11 = arith.constant dense<0.000000e+00> : vector<8x32xf32>
    %11 = vector.multi_reduction <add>, %9, %cst_11 [1] : vector<8x128x32xf32> to vector<8x32xf32>
    %12 = arith.addf %10, %11 : vector<8x32xf32>
    %c0_12 = arith.constant 0 : index
    %c0_13 = arith.constant 0 : index
    %13 = vector.load %arg13[%c0_12, %c0_13] : memref<8x32xf32, #tpu.memory_space<vmem>>, vector<8x32xf32>
    tpu.vector_store %arg13[%c0_12, %c0_13], %12 {strides = array<i32>} : memref<8x32xf32, #tpu.memory_space<vmem>>, vector<8x32xf32>,
    %c0_i32_14 = arith.constant 0 : i32
    %14 = arith.cmpi eq, %arg1, %c0_i32_14 : i32
    %15 = arith.extui %14 : i1 to i32
    %c0_i32_15 = arith.constant 0 : i32
    %16 = arith.cmpi ne, %15, %c0_i32_15 : i32
    scf.if %16 {
      %c0_16 = arith.constant 0 : index
      %c0_17 = arith.constant 0 : index
      %17 = vector.load %arg13[%c0_16, %c0_17] : memref<8x32xf32, #tpu.memory_space<vmem>>, vector<8x32xf32>
      %18 = arith.truncf %17 : vector<8x32xf32> to vector<8x32xbf16>
      %c0_18 = arith.constant 0 : index
      %c0_19 = arith.constant 0 : index
      %19 = vector.load %arg6[%c0_18, %c0_19] : memref<32x128xbf16, #tpu.memory_space<vmem>>, vector<32x128xbf16>
      %cst_20 = arith.constant dense<0.000000e+00> : vector<8x128xf32>
      %20 = tpu.matmul %18, %19, %cst_20 {dimension_numbers = #tpu.dot_dimension_numbers<[1], [0], [0], [1], [0, 0, 1, 1], [], []>} : vector<8x32xbf16>, vector<32x128xbf16>, vector<8x128xf32> -> vector<8x128xf32>
      %c0_21 = arith.constant 0 : index
      %c0_22 = arith.constant 0 : index
      %21 = vector.load %arg7[%c0_21, %c0_22] : memref<1x128xf32, #tpu.memory_space<vmem>>, vector<1x128xf32>
      %22 = vector.broadcast %21 : vector<1x128xf32> to vector<8x128xf32>
      %23 = arith.addf %20, %22 : vector<8x128xf32>
      %cst_23 = arith.constant 0.000000e+00 : f32
      %24 = vector.broadcast %cst_23 : f32 to vector<8x128xf32>
      %25 = arith.maximumf %23, %24 : vector<8x128xf32>
      %26 = arith.truncf %25 : vector<8x128xf32> to vector<8x128xbf16>
      %c0_24 = arith.constant 0 : index
      %c0_25 = arith.constant 0 : index
      %27 = vector.load %arg8[%c0_24, %c0_25] : memref<128x32xbf16, #tpu.memory_space<vmem>>, vector<128x32xbf16>
      %cst_26 = arith.constant dense<0.000000e+00> : vector<8x32xf32>
      %28 = tpu.matmul %26, %27, %cst_26 {dimension_numbers = #tpu.dot_dimension_numbers<[1], [0], [0], [1], [0, 0, 1, 1], [], []>} : vector<8x128xbf16>, vector<128x32xbf16>, vector<8x32xf32> -> vector<8x32xf32>
      %c0_27 = arith.constant 0 : index
      %c0_28 = arith.constant 0 : index
      %29 = vector.load %arg9[%c0_27, %c0_28] : memref<1x32xf32, #tpu.memory_space<vmem>>, vector<1x32xf32>
      %30 = vector.broadcast %29 : vector<1x32xf32> to vector<8x32xf32>
      %31 = arith.addf %28, %30 : vector<8x32xf32>
      %c0_29 = arith.constant 0 : index
      %c0_30 = arith.constant 0 : index
      %32 = vector.load %arg5[%c0_29, %c0_30] : memref<8x32xf32, #tpu.memory_space<vmem>>, vector<8x32xf32>
      %33 = arith.addf %31, %32 : vector<8x32xf32>
      %cst_31 = arith.constant dense<0.000000e+00> : vector<8xf32>
      %34 = vector.multi_reduction <add>, %33, %cst_31 [1] : vector<8x32xf32> to vector<8xf32>
      %35 = vector.shape_cast %34 : vector<8xf32> to vector<8x1xf32>
      %cst_32 = arith.constant 3.200000e+01 : f32
      %36 = vector.broadcast %cst_32 : f32 to vector<8x1xf32>
      %37 = arith.divf %35, %36 : vector<8x1xf32>
      %38 = vector.broadcast %37 : vector<8x1xf32> to vector<8x32xf32>
      %39 = arith.subf %33, %38 : vector<8x32xf32>
      %40 = arith.mulf %39, %39 : vector<8x32xf32>
      %cst_33 = arith.constant dense<0.000000e+00> : vector<8xf32>
      %41 = vector.multi_reduction <add>, %40, %cst_33 [1] : vector<8x32xf32> to vector<8xf32>
      %42 = vector.shape_cast %41 : vector<8xf32> to vector<8x1xf32>
      %cst_34 = arith.constant 3.200000e+01 : f32
      %43 = vector.broadcast %cst_34 : f32 to vector<8x1xf32>
      %44 = arith.divf %42, %43 : vector<8x1xf32>
      %cst_35 = arith.constant 9.99999974E-6 : f32
      %45 = vector.broadcast %cst_35 : f32 to vector<8x1xf32>
      %46 = arith.addf %44, %45 : vector<8x1xf32>
      %47 = math.rsqrt %46 : vector<8x1xf32>
      %48 = vector.broadcast %47 : vector<8x1xf32> to vector<8x32xf32>
      %49 = arith.mulf %39, %48 : vector<8x32xf32>
      %c0_36 = arith.constant 0 : index
      %c0_37 = arith.constant 0 : index
      %50 = vector.load %arg10[%c0_36, %c0_37] : memref<1x32xf32, #tpu.memory_space<vmem>>, vector<1x32xf32>
      %51 = vector.broadcast %50 : vector<1x32xf32> to vector<8x32xf32>
      %52 = arith.mulf %49, %51 : vector<8x32xf32>
      %c0_38 = arith.constant 0 : index
      %c0_39 = arith.constant 0 : index
      %53 = vector.load %arg11[%c0_38, %c0_39] : memref<1x32xf32, #tpu.memory_space<vmem>>, vector<1x32xf32>
      %54 = vector.broadcast %53 : vector<1x32xf32> to vector<8x32xf32>
      %55 = arith.addf %52, %54 : vector<8x32xf32>
      %c0_40 = arith.constant 0 : index
      %c0_41 = arith.constant 0 : index
      %56 = vector.load %arg12[%c0_40, %c0_41] : memref<8x32xf32, #tpu.memory_space<vmem>>, vector<8x32xf32>
      tpu.vector_store %arg12[%c0_40, %c0_41], %55 {strides = array<i32>} : memref<8x32xf32, #tpu.memory_space<vmem>>, vector<8x32xf32>,
    } else {
    }
    return
  }
  func.func @transform_0(%arg0: i32, %arg1: i32) -> (i32, i32) {
    %c0_i32 = arith.constant 0 : i32
    return %arg0, %arg1 : i32, i32
  }
  func.func @transform_1(%arg0: i32, %arg1: i32) -> (i32, i32, i32) {
    %c0_i32 = arith.constant 0 : i32
    %c0_i32_0 = arith.constant 0 : i32
    return %arg0, %arg1, %c0_i32 : i32, i32, i32
  }
  func.func @transform_2(%arg0: i32, %arg1: i32) -> (i32, i32) {
    %c0_i32 = arith.constant 0 : i32
    %c0_i32_0 = arith.constant 0 : i32
    return %arg1, %c0_i32 : i32, i32
  }
  func.func @transform_3(%arg0: i32, %arg1: i32) -> (i32, i32) {
    %c0_i32 = arith.constant 0 : i32
    %c0_i32_0 = arith.constant 0 : i32
    return %arg0, %c0_i32 : i32, i32
  }
  func.func @transform_4(%arg0: i32, %arg1: i32) -> (i32, i32) {
    %c0_i32 = arith.constant 0 : i32
    %c0_i32_0 = arith.constant 0 : i32
    %c0_i32_1 = arith.constant 0 : i32
    return %c0_i32, %c0_i32_0 : i32, i32
  }
  func.func @transform_5(%arg0: i32, %arg1: i32) -> (i32, i32) {
    %c0_i32 = arith.constant 0 : i32
    %c0_i32_0 = arith.constant 0 : i32
    %c0_i32_1 = arith.constant 0 : i32
    return %c0_i32, %c0_i32_0 : i32, i32
  }
  func.func @transform_6(%arg0: i32, %arg1: i32) -> (i32, i32) {
    %c0_i32 = arith.constant 0 : i32
    %c0_i32_0 = arith.constant 0 : i32
    %c0_i32_1 = arith.constant 0 : i32
    return %c0_i32, %c0_i32_0 : i32, i32
  }
  func.func @transform_7(%arg0: i32, %arg1: i32) -> (i32, i32) {
    %c0_i32 = arith.constant 0 : i32
    %c0_i32_0 = arith.constant 0 : i32
    %c0_i32_1 = arith.constant 0 : i32
    return %c0_i32, %c0_i32_0 : i32, i32
  }
  func.func @transform_8(%arg0: i32, %arg1: i32) -> (i32, i32) {
    %c0_i32 = arith.constant 0 : i32
    %c0_i32_0 = arith.constant 0 : i32
    %c0_i32_1 = arith.constant 0 : i32
    return %c0_i32, %c0_i32_0 : i32, i32
  }
  func.func @transform_9(%arg0: i32, %arg1: i32) -> (i32, i32) {
    %c0_i32 = arith.constant 0 : i32
    %c0_i32_0 = arith.constant 0 : i32
    %c0_i32_1 = arith.constant 0 : i32
    return %c0_i32, %c0_i32_0 : i32, i32
  }
  func.func @transform_10(%arg0: i32, %arg1: i32) -> (i32, i32) {
    %c0_i32 = arith.constant 0 : i32
    %c0_i32_0 = arith.constant 0 : i32
    return %arg0, %c0_i32 : i32, i32
  }
}

</mosaic_0001>

<bundles_post_ra>
// kernel: tpu_custom_call.1
= control target key start
LH: loop header
LB: loop body
LE: loop exit
PB: predicated region body
PF: predicated region fallthrough
CT: control target
= control target key end

     0   :  { %v977_v1 = vmov 0.0   ;;  %vm978_vm0 = vmmov 0   ;;  %s1661_s0 = inlined_call_operand.vmem [shape: bf16[8,128], index: 0, kind: input, shape index: {}]   ;;  %s1662_s1 = inlined_call_operand.vmem [shape: f32[8,128,32], index: 1, kind: input, shape index: {}]   ;;  %s1663_s2 = inlined_call_operand.vmem [shape: bf16[128,32], index: 2, kind: input, shape index: {}]   ;;  %s1664_s3 = inlined_call_operand.vmem [shape: f32[8,32], index: 3, kind: input, shape index: {}]   ;;  %s1665_s4 = inlined_call_operand.vmem [shape: bf16[32,128], index: 4, kind: input, shape index: {}]   ;;  %s1666_s5 = inlined_call_operand.vmem [shape: f32[1,128], index: 5, kind: input, shape index: {}]   ;;  %s1667_s6 = inlined_call_operand.vmem [shape: bf16[128,32], index: 6, kind: input, shape index: {}]   ;;  %s1668_s7 = inlined_call_operand.vmem [shape: f32[1,32], index: 7, kind: input, shape index: {}]   ;;  %s1669_s8 = inlined_call_operand.vmem [shape: f32[1,32], index: 8, kind: input, shape index: {}]   ;;  %s1670_s9 = inlined_call_operand.vmem [shape: f32[1,32], index: 9, kind: input, shape index: {}]   ;;  %s1671_s10 = inlined_call_operand.hbm [shape: f32[8,32], index: 10, kind: output, shape index: {}]  }
   0x1   :  { %v933_v0 = vld [vmem:[%s1663_s2] sm:$0xff]   ;;  %882 = vmatprep.subr.bf16.mxu0 %v977_v1  ;;  %902 = vmatprep.subr.bf16.mxu1 %v977_v1  ;;  %v934_v2 = vld [vmem:[%s1663_s2 + $0x8] sm:$0xff]   ;;  %v935_v3 = vld [vmem:[%s1663_s2 + $0x10] sm:$0xff]  }
   0x2   :  { %883 = vmatpush3.bf16.msra.mxu0 %v933_v0  ;;  %898 = vmatprep.mubr.msk.bf16.mxu0 %vm978_vm0, %v977_v1  ;;  %v936_v4 = vld [vmem:[%s1663_s2 + $0x18] sm:$0xff]   ;;  %v937_v5 = vld [vmem:[%s1663_s2 + $0x20] sm:$0xff]  }
   0x3   :  { %884 = vmatprep.subr.bf16.mxu0 %v977_v1  ;;  %906 = vmatprep.mubr.msk.bf16.mxu1 %vm978_vm0, %v977_v1 }
   0x6   :  { %885 = vmatpush3.bf16.msra.mxu0 %v934_v2 }
   0x7   :  { %886 = vmatprep.subr.bf16.mxu0 %v977_v1 }
   0xa   :  { %887 = vmatpush3.bf16.msra.mxu0 %v935_v3 }
   0xb   :  { %888 = vmatprep.subr.bf16.mxu0 %v977_v1 }
   0xe   :  { %889 = vmatpush3.bf16.msra.mxu0 %v936_v4 }
   0xf   :  { %890 = vmatprep.subr.bf16.mxu0 %v977_v1 }
  0x10   :  { %15 = vsyncpa [#allocation4], 0  ;;  %v938_v6 = vld [vmem:[%s1663_s2 + $0x28] sm:$0xff]   ;;  %v939_v7 = vld [vmem:[%s1663_s2 + $0x30] sm:$0xff]   ;;  %vm146_vm1 = vcmask 261120   ;;  %vm590_vm2 = vcmask 1041409  }
  0x11   :  { %v940_v8 = vld [vmem:[%s1663_s2 + $0x38] sm:$0xff]   ;;  %v37_v9 = vld [vmem:[%s1661_s0] sm:$0xf]  ;;  %v942_v11 = vld [vmem:[%s1665_s4 + $0x8] sm:$0xff]   ;;  %vm592_vm3 = vcmask 1042434   ;;  %vm594_vm4 = vcmask 1043459  }
  0x12   :  { %891 = vmatpush3.bf16.msra.mxu0 %v937_v5  ;;  %v941_v10 = vld [vmem:[%s1665_s4] sm:$0xff]   ;;  %v157_v13 = vld [vmem:[%s1662_s1 + $0x8] sm:$0xff]  ;;  %v158_v18 = vld [vmem:[%s1662_s1 + $0x10] sm:$0xff]  ;;  %vm596_vm5 = vcmask 1044484   ;;  %vm598_vm6 = vcmask 1045509   ;;  %vm600_vm7 = vcmask 1046534  }
  0x13   :  { %892 = vmatprep.subr.bf16.mxu0 %v977_v1  ;;  %903 = vmatpush3.bf16.msra.mxu1 %v941_v10  ;;  %v156_v12 = vld [vmem:[%s1662_s1] sm:$0xff]  ;;  %v173_v15 = vld [vmem:[%s1662_s1 + $0x88] sm:$0xff]  ;;  %v287_v17 = vsel %vm146_vm1, %v157_v13, 0.0  ;;  %v174_v24 = vld [vmem:[%s1662_s1 + $0x90] sm:$0xff]  ;;  %v289_v25 = vsel %vm146_vm1, %v158_v18, 0.0  ;;  %vm602_vm8 = vcmask 1047559  }
  0x14   :  { %904 = vmatprep.subr.bf16.mxu1 %v977_v1  ;;  %v172_v14 = vld [vmem:[%s1662_s1 + $0x80] sm:$0xff]  ;;  %v286_v16 = vsel %vm146_vm1, %v156_v12, 0.0  ;;  %v189_v20 = vld [vmem:[%s1662_s1 + $0x108] sm:$0xff]  ;;  %v324_v23 = vsel %vm146_vm1, %v173_v15, 0.0  ;;  %v159_v28 = vld [vmem:[%s1662_s1 + $0x18] sm:$0xff]  ;;  %v326_v34 = vsel %vm146_vm1, %v174_v24, 0.0 }
  0x15   :  { %v188_v19 = vld [vmem:[%s1662_s1 + $0x100] sm:$0xff]  ;;  %v288_v21 = vadd.f32 %v287_v17, %v286_v16  ;;  %v323_v22 = vsel %vm146_vm1, %v172_v14, 0.0  ;;  %v361_v27 = vsel %vm146_vm1, %v189_v20, 0.0  ;;  %v190_v29 = vld [vmem:[%s1662_s1 + $0x110] sm:$0xff]  ;;  %v205_v32 = vld [vmem:[%s1662_s1 + $0x188] sm:$0xff]  ;;  %v291_v37 = vsel %vm146_vm1, %v159_v28, 0.0 }
  0x16   :  { %893 = vmatpush3.bf16.msra.mxu0 %v938_v6  ;;  %v360_v26 = vsel %vm146_vm1, %v188_v19, 0.0  ;;  %v325_v30 = vadd.f32 %v324_v23, %v323_v22  ;;  %v204_v31 = vld [vmem:[%s1662_s1 + $0x180] sm:$0xff]  ;;  %v175_v36 = vld [vmem:[%s1662_s1 + $0x98] sm:$0xff]  ;;  %v363_v38 = vsel %vm146_vm1, %v190_v29, 0.0  ;;  %v221_v42 = vld [vmem:[%s1662_s1 + $0x208] sm:$0xff]  ;;  %v398_v45 = vsel %vm146_vm1, %v205_v32, 0.0 }
  0x17   :  { %894 = vmatprep.subr.bf16.mxu0 %v977_v1  ;;  %905 = vmatpush3.bf16.msra.mxu1 %v942_v11  ;;  %v290_v33 = vadd.f32 %v289_v25, %v288_v21  ;;  %v362_v35 = vadd.f32 %v361_v27, %v360_v26  ;;  %v160_v39 = vld [vmem:[%s1662_s1 + $0x20] sm:$0xff]  ;;  %v191_v40 = vld [vmem:[%s1662_s1 + $0x118] sm:$0xff]  ;;  %v397_v44 = vsel %vm146_vm1, %v204_v31, 0.0  ;;  %v206_v46 = vld [vmem:[%s1662_s1 + $0x190] sm:$0xff]  ;;  %v328_v48 = vsel %vm146_vm1, %v175_v36, 0.0  ;;  %s979_s15 = smov [#allocation3]  }
  0x18   :  { %910 = vmatprep.subr.bf16.mxu1 %v977_v1  ;;  %v220_v41 = vld [vmem:[%s1662_s1 + $0x200] sm:$0xff]  ;;  %v327_v43 = vadd.f32 %v326_v34, %v325_v30  ;;  %v293_v51 = vsel %vm146_vm1, %v160_v39, 0.0  ;;  %v365_v52 = vsel %vm146_vm1, %v191_v40, 0.0  ;;  %v237_v55 = vld [vmem:[%s1662_s1 + $0x288] sm:$0xff]  ;;  %v399_v56 = vadd.f32 %v398_v45, %v397_v44  ;;  %v222_v60 = vld [vmem:[%s1662_s1 + $0x210] sm:$0xff]  ;;  %s830_s0 = sshll.u32 %s979_s15, 4  ;;  %s831_s0 = int_to_ptr.vmem [resolvable:$true] %s830_s0 }
  0x19   :  { %v292_v47 = vadd.f32 %v291_v37, %v290_v33  ;;  %v364_v49 = vadd.f32 %v363_v38, %v362_v35  ;;  %v176_v50 = vld [vmem:[%s1662_s1 + $0xa0] sm:$0xff]  ;;  %v434_v57 = vsel %vm146_vm1, %v220_v41, 0.0  ;;  %v435_v58 = vsel %vm146_vm1, %v221_v42, 0.0  ;;  %v161_v59 = vld [vmem:[%s1662_s1 + $0x28] sm:$0xff]  ;;  %v207_v0 = vld [vmem:[%s1662_s1 + $0x198] sm:$0xff]  ;;  %p958_p1 = scmp.lt.s32.totalorder %s831_s0, %s831_s0 }
  0x1a   :  { %895 = vmatpush3.bf16.msra.mxu0 %v939_v7  ;;  %v192_v53 = vld [vmem:[%s1662_s1 + $0x120] sm:$0xff]  ;;  %v329_v61 = vadd.f32 %v328_v48, %v327_v43  ;;  %v400_v62 = vsel %vm146_vm1, %v206_v46, 0.0  ;;  %v177_v63 = vld [vmem:[%s1662_s1 + $0xa8] sm:$0xff]  ;;  %v330_v3 = vsel %vm146_vm1, %v176_v50, 0.0  ;;  %v472_v10 = vsel %vm146_vm1, %v237_v55, 0.0  ;;  %v238_v12 = vld [vmem:[%s1662_s1 + $0x290] sm:$0xff] }
  0x1b   :  { %896 = vmatprep.subr.bf16.mxu0 %v977_v1  ;;  %v236_v54 = vld [vmem:[%s1662_s1 + $0x280] sm:$0xff]  ;;  %v294_v2 = vadd.f32 %v293_v51, %v292_v47  ;;  %v366_v4 = vadd.f32 %v365_v52, %v364_v49  ;;  %v253_v6 = vld [vmem:[%s1662_s1 + $0x308] sm:$0xff]  ;;  %v367_v7 = vsel %vm146_vm1, %v192_v53, 0.0  ;;  %v295_v13 = vsel %vm146_vm1, %v161_v59, 0.0  ;;  %v162_v16 = vld [vmem:[%s1662_s1 + $0x30] sm:$0xff] }
  0x1c   :  { %v252_v5 = vld [vmem:[%s1662_s1 + $0x300] sm:$0xff]  ;;  %v193_v11 = vld [vmem:[%s1662_s1 + $0x128] sm:$0xff]  ;;  %v401_v14 = vadd.f32 %v400_v62, %v399_v56  ;;  %v437_v15 = vsel %vm146_vm1, %v222_v60, 0.0  ;;  %v223_v18 = vld [vmem:[%s1662_s1 + $0x218] sm:$0xff]  ;;  %v331_v19 = vadd.f32 %v330_v3, %v329_v61  ;;  %v332_v20 = vsel %vm146_vm1, %v177_v63, 0.0 }
  0x1d   :  { %v208_v17 = vld [vmem:[%s1662_s1 + $0x1a0] sm:$0xff]  ;;  %v402_v21 = vsel %vm146_vm1, %v207_v0, 0.0  ;;  %v269_v23 = vld [vmem:[%s1662_s1 + $0x388] sm:$0xff]  ;;  %v368_v24 = vadd.f32 %v367_v7, %v366_v4  ;;  %v508_v26 = vsel %vm146_vm1, %v252_v5, 0.0  ;;  %v509_v27 = vsel %vm146_vm1, %v253_v6, 0.0  ;;  %v178_v28 = vld [vmem:[%s1662_s1 + $0xb0] sm:$0xff] }
  0x1e   :  { %897 = vmatpush3.bf16.msra.mxu0 %v940_v8  ;;  %v436_v8 = vadd.f32 %v435_v58, %v434_v57  ;;  %v268_v22 = vld [vmem:[%s1662_s1 + $0x380] sm:$0xff]  ;;  %v254_v29 = vld [vmem:[%s1662_s1 + $0x310] sm:$0xff]  ;;  %v296_v30 = vadd.f32 %v295_v13, %v294_v2  ;;  %v369_v31 = vsel %vm146_vm1, %v193_v11, 0.0  ;;  %v474_v33 = vsel %vm146_vm1, %v238_v12, 0.0  ;;  %v239_v35 = vld [vmem:[%s1662_s1 + $0x298] sm:$0xff] }
  0x1f   :  { %v194_v34 = vld [vmem:[%s1662_s1 + $0x130] sm:$0xff]  ;;  %v297_v36 = vsel %vm146_vm1, %v162_v16, 0.0  ;;  %v403_v37 = vadd.f32 %v402_v21, %v401_v14  ;;  %v404_v38 = vsel %vm146_vm1, %v208_v17, 0.0  ;;  %v439_v39 = vsel %vm146_vm1, %v223_v18, 0.0  ;;  %v163_v40 = vld [vmem:[%s1662_s1 + $0x38] sm:$0xff]  ;;  %v224_v41 = vld [vmem:[%s1662_s1 + $0x220] sm:$0xff] }
  0x20   :  { %v438_v32 = vadd.f32 %v437_v15, %v436_v8  ;;  %v333_v42 = vadd.f32 %v332_v20, %v331_v19  ;;  %v510_v43 = vadd.f32 %v509_v27, %v508_v26  ;;  %v545_v44 = vsel %vm146_vm1, %v268_v22, 0.0  ;;  %v209_v46 = vld [vmem:[%s1662_s1 + $0x1a8] sm:$0xff]  ;;  %v270_v47 = vld [vmem:[%s1662_s1 + $0x390] sm:$0xff]  ;;  %v179_v52 = vld [vmem:[%s1662_s1 + $0xb8] sm:$0xff] }
  0x21   :  { %899 = vmatmul.mubr.bf16.vlgmr.msra.gmra.mrb[0].mxu0 %v37_v9  ;;  %v471_v9 = vsel %vm146_vm1, %v236_v54, 0.0  ;;  %v546_v45 = vsel %vm146_vm1, %v269_v23, 0.0  ;;  %v334_v48 = vsel %vm146_vm1, %v178_v28, 0.0  ;;  %v370_v49 = vadd.f32 %v369_v31, %v368_v24  ;;  %v255_v53 = vld [vmem:[%s1662_s1 + $0x318] sm:$0xff]  ;;  %v240_v59 = vld [vmem:[%s1662_s1 + $0x2a0] sm:$0xff]  ;;  %v225_v2 = vld [vmem:[%s1662_s1 + $0x228] sm:$0xff] }
  0x22   :  { %v473_v25 = vadd.f32 %v472_v10, %v471_v9  ;;  %v511_v51 = vsel %vm146_vm1, %v254_v29, 0.0  ;;  %v298_v54 = vadd.f32 %v297_v36, %v296_v30  ;;  %v371_v55 = vsel %vm146_vm1, %v194_v34, 0.0  ;;  %v195_v58 = vld [vmem:[%s1662_s1 + $0x138] sm:$0xff]  ;;  %v164_v0 = vld [vmem:[%s1662_s1 + $0x40] sm:$0xff]  ;;  %v210_v7 = vld [vmem:[%s1662_s1 + $0x1b0] sm:$0xff] }
  0x23   :  { %v440_v56 = vadd.f32 %v439_v39, %v438_v32  ;;  %v476_v57 = vsel %vm146_vm1, %v239_v35, 0.0  ;;  %v299_v60 = vsel %vm146_vm1, %v163_v40, 0.0  ;;  %v405_v61 = vadd.f32 %v404_v38, %v403_v37  ;;  %v271_v8 = vld [vmem:[%s1662_s1 + $0x398] sm:$0xff]  ;;  %v180_v13 = vld [vmem:[%s1662_s1 + $0xc0] sm:$0xff]  ;;  %v241_v20 = vld [vmem:[%s1662_s1 + $0x2a8] sm:$0xff] }
  0x24   :  { %v475_v50 = vadd.f32 %v474_v33, %v473_v25  ;;  %v441_v62 = vsel %vm146_vm1, %v224_v41, 0.0  ;;  %v547_v63 = vadd.f32 %v546_v45, %v545_v44  ;;  %v335_v3 = vadd.f32 %v334_v48, %v333_v42  ;;  %v256_v14 = vld [vmem:[%s1662_s1 + $0x320] sm:$0xff]  ;;  %v165_v25 = vld [vmem:[%s1662_s1 + $0x48] sm:$0xff]  ;;  %v226_v26 = vld [vmem:[%s1662_s1 + $0x230] sm:$0xff] }
  0x25   :  { %v406_v4 = vsel %vm146_vm1, %v209_v46, 0.0  ;;  %v512_v5 = vadd.f32 %v511_v51, %v510_v43  ;;  %v548_v6 = vsel %vm146_vm1, %v270_v47, 0.0  ;;  %v336_v9 = vsel %vm146_vm1, %v179_v52, 0.0  ;;  %v196_v19 = vld [vmem:[%s1662_s1 + $0x140] sm:$0xff]  ;;  %v211_v31 = vld [vmem:[%s1662_s1 + $0x1b8] sm:$0xff]  ;;  %v181_v37 = vld [vmem:[%s1662_s1 + $0xc8] sm:$0xff] }
  0x26   :  { %v372_v10 = vadd.f32 %v371_v55, %v370_v49  ;;  %v477_v11 = vadd.f32 %v476_v57, %v475_v50  ;;  %v513_v12 = vsel %vm146_vm1, %v255_v53, 0.0  ;;  %v300_v15 = vadd.f32 %v299_v60, %v298_v54  ;;  %v272_v32 = vld [vmem:[%s1662_s1 + $0x3a0] sm:$0xff]  ;;  %v257_v38 = vld [vmem:[%s1662_s1 + $0x328] sm:$0xff]  ;;  %v242_v44 = vld [vmem:[%s1662_s1 + $0x2b0] sm:$0xff] }
  0x27   :  { %v373_v16 = vsel %vm146_vm1, %v195_v58, 0.0  ;;  %v442_v17 = vadd.f32 %v441_v62, %v440_v56  ;;  %v478_v18 = vsel %vm146_vm1, %v240_v59, 0.0  ;;  %v301_v21 = vsel %vm146_vm1, %v164_v0, 0.0  ;;  %v197_v43 = vld [vmem:[%s1662_s1 + $0x148] sm:$0xff]  ;;  %v166_v49 = vld [vmem:[%s1662_s1 + $0x50] sm:$0xff]  ;;  %v227_v50 = vld [vmem:[%s1662_s1 + $0x238] sm:$0xff] }
  0x28   :  { %v407_v22 = vadd.f32 %v406_v4, %v405_v61  ;;  %v443_v23 = vsel %vm146_vm1, %v225_v2, 0.0  ;;  %v549_v24 = vadd.f32 %v548_v6, %v547_v63  ;;  %v337_v27 = vadd.f32 %v336_v9, %v335_v3  ;;  %v212_v55 = vld [vmem:[%s1662_s1 + $0x1c0] sm:$0xff]  ;;  %v273_v56 = vld [vmem:[%s1662_s1 + $0x3a8] sm:$0xff]  ;;  %v182_v61 = vld [vmem:[%s1662_s1 + $0xd0] sm:$0xff] }
  0x29   :  { %v408_v28 = vsel %vm146_vm1, %v210_v7, 0.0  ;;  %v514_v29 = vadd.f32 %v513_v12, %v512_v5  ;;  %v550_v30 = vsel %vm146_vm1, %v271_v8, 0.0  ;;  %v338_v33 = vsel %vm146_vm1, %v180_v13, 0.0  ;;  %v258_v62 = vld [vmem:[%s1662_s1 + $0x330] sm:$0xff]  ;;  %v243_v5 = vld [vmem:[%s1662_s1 + $0x2b8] sm:$0xff] }
  0x2a   :  { %v374_v34 = vadd.f32 %v373_v16, %v372_v10  ;;  %v479_v35 = vadd.f32 %v478_v18, %v477_v11  ;;  %v515_v36 = vsel %vm146_vm1, %v256_v14, 0.0  ;;  %v302_v39 = vadd.f32 %v301_v21, %v300_v15  ;;  %v198_v4 = vld [vmem:[%s1662_s1 + $0x150] sm:$0xff]  ;;  %v167_v10 = vld [vmem:[%s1662_s1 + $0x58] sm:$0xff]  ;;  %v228_v11 = vld [vmem:[%s1662_s1 + $0x240] sm:$0xff] }
  0x2b   :  { %v375_v40 = vsel %vm146_vm1, %v196_v19, 0.0  ;;  %v444_v41 = vadd.f32 %v443_v23, %v442_v17  ;;  %v480_v42 = vsel %vm146_vm1, %v241_v20, 0.0  ;;  %v303_v45 = vsel %vm146_vm1, %v165_v25, 0.0  ;;  %v213_v16 = vld [vmem:[%s1662_s1 + $0x1c8] sm:$0xff]  ;;  %v274_v17 = vld [vmem:[%s1662_s1 + $0x3b0] sm:$0xff]  ;;  %v259_v23 = vld [vmem:[%s1662_s1 + $0x338] sm:$0xff] }
  0x2c   :  { %v409_v46 = vadd.f32 %v408_v28, %v407_v22  ;;  %v445_v47 = vsel %vm146_vm1, %v226_v26, 0.0  ;;  %v551_v48 = vadd.f32 %v550_v30, %v549_v24  ;;  %v339_v51 = vadd.f32 %v338_v33, %v337_v27  ;;  %v183_v22 = vld [vmem:[%s1662_s1 + $0xd8] sm:$0xff] }
  0x2d   :  { %v410_v52 = vsel %vm146_vm1, %v211_v31, 0.0  ;;  %v516_v53 = vadd.f32 %v515_v36, %v514_v29  ;;  %v552_v54 = vsel %vm146_vm1, %v272_v32, 0.0  ;;  %v340_v57 = vsel %vm146_vm1, %v181_v37, 0.0  ;;  %v199_v28 = vld [vmem:[%s1662_s1 + $0x158] sm:$0xff]  ;;  %v244_v29 = vld [vmem:[%s1662_s1 + $0x2c0] sm:$0xff] }
  0x2e   :  { %v376_v58 = vadd.f32 %v375_v40, %v374_v34  ;;  %v481_v59 = vadd.f32 %v480_v42, %v479_v35  ;;  %v517_v60 = vsel %vm146_vm1, %v257_v38, 0.0  ;;  %v304_v63 = vadd.f32 %v303_v45, %v302_v39  ;;  %v168_v34 = vld [vmem:[%s1662_s1 + $0x60] sm:$0xff]  ;;  %v229_v35 = vld [vmem:[%s1662_s1 + $0x248] sm:$0xff]  ;;  %v214_v40 = vld [vmem:[%s1662_s1 + $0x1d0] sm:$0xff] }
  0x2f   :  { %v377_v0 = vsel %vm146_vm1, %v197_v43, 0.0  ;;  %v446_v2 = vadd.f32 %v445_v47, %v444_v41  ;;  %v482_v3 = vsel %vm146_vm1, %v242_v44, 0.0  ;;  %v305_v6 = vsel %vm146_vm1, %v166_v49, 0.0  ;;  %v275_v41 = vld [vmem:[%s1662_s1 + $0x3b8] sm:$0xff]  ;;  %v260_v47 = vld [vmem:[%s1662_s1 + $0x340] sm:$0xff] }
  0x30   :  { %v411_v7 = vadd.f32 %v410_v52, %v409_v46  ;;  %v447_v8 = vsel %vm146_vm1, %v227_v50, 0.0  ;;  %v553_v9 = vadd.f32 %v552_v54, %v551_v48  ;;  %v341_v12 = vadd.f32 %v340_v57, %v339_v51  ;;  %v184_v46 = vld [vmem:[%s1662_s1 + $0xe0] sm:$0xff] }
  0x31   :  { %v412_v13 = vsel %vm146_vm1, %v212_v55, 0.0  ;;  %v518_v14 = vadd.f32 %v517_v60, %v516_v53  ;;  %v554_v15 = vsel %vm146_vm1, %v273_v56, 0.0  ;;  %v342_v18 = vsel %vm146_vm1, %v182_v61, 0.0  ;;  %v200_v52 = vld [vmem:[%s1662_s1 + $0x160] sm:$0xff]  ;;  %v245_v53 = vld [vmem:[%s1662_s1 + $0x2c8] sm:$0xff] }
  0x32   :  { %v378_v19 = vadd.f32 %v377_v0, %v376_v58  ;;  %v483_v20 = vadd.f32 %v482_v3, %v481_v59  ;;  %v519_v21 = vsel %vm146_vm1, %v258_v62, 0.0  ;;  %v306_v24 = vadd.f32 %v305_v6, %v304_v63  ;;  %v169_v58 = vld [vmem:[%s1662_s1 + $0x68] sm:$0xff]  ;;  %v230_v59 = vld [vmem:[%s1662_s1 + $0x250] sm:$0xff]  ;;  %v215_v0 = vld [vmem:[%s1662_s1 + $0x1d8] sm:$0xff] }
  0x33   :  { %v379_v25 = vsel %vm146_vm1, %v198_v4, 0.0  ;;  %v448_v26 = vadd.f32 %v447_v8, %v446_v2  ;;  %v484_v27 = vsel %vm146_vm1, %v243_v5, 0.0  ;;  %v307_v30 = vsel %vm146_vm1, %v167_v10, 0.0  ;;  %v276_v2 = vld [vmem:[%s1662_s1 + $0x3c0] sm:$0xff]  ;;  %v261_v8 = vld [vmem:[%s1662_s1 + $0x348] sm:$0xff] }
  0x34   :  { %v413_v31 = vadd.f32 %v412_v13, %v411_v7  ;;  %v449_v32 = vsel %vm146_vm1, %v228_v11, 0.0  ;;  %v555_v33 = vadd.f32 %v554_v15, %v553_v9  ;;  %v343_v36 = vadd.f32 %v342_v18, %v341_v12  ;;  %v185_v7 = vld [vmem:[%s1662_s1 + $0xe8] sm:$0xff]  ;;  %v246_v13 = vld [vmem:[%s1662_s1 + $0x2d0] sm:$0xff] }
  0x35   :  { %v414_v37 = vsel %vm146_vm1, %v213_v16, 0.0  ;;  %v520_v38 = vadd.f32 %v519_v21, %v518_v14  ;;  %v556_v39 = vsel %vm146_vm1, %v274_v17, 0.0  ;;  %v344_v42 = vsel %vm146_vm1, %v183_v22, 0.0  ;;  %v201_v18 = vld [vmem:[%s1662_s1 + $0x168] sm:$0xff] }
  0x36   :  { %v380_v43 = vadd.f32 %v379_v25, %v378_v19  ;;  %v485_v44 = vadd.f32 %v484_v27, %v483_v20  ;;  %v521_v45 = vsel %vm146_vm1, %v259_v23, 0.0  ;;  %v308_v48 = vadd.f32 %v307_v30, %v306_v24  ;;  %v231_v19 = vld [vmem:[%s1662_s1 + $0x258] sm:$0xff]  ;;  %v170_v23 = vld [vmem:[%s1662_s1 + $0x70] sm:$0xff]  ;;  %v216_v24 = vld [vmem:[%s1662_s1 + $0x1e0] sm:$0xff] }
  0x37   :  { %v381_v49 = vsel %vm146_vm1, %v199_v28, 0.0  ;;  %v450_v50 = vadd.f32 %v449_v32, %v448_v26  ;;  %v486_v51 = vsel %vm146_vm1, %v244_v29, 0.0  ;;  %v309_v54 = vsel %vm146_vm1, %v168_v34, 0.0  ;;  %v277_v25 = vld [vmem:[%s1662_s1 + $0x3c8] sm:$0xff]  ;;  %v262_v30 = vld [vmem:[%s1662_s1 + $0x350] sm:$0xff] }
  0x38   :  { %v415_v55 = vadd.f32 %v414_v37, %v413_v31  ;;  %v451_v56 = vsel %vm146_vm1, %v229_v35, 0.0  ;;  %v557_v57 = vadd.f32 %v556_v39, %v555_v33  ;;  %v345_v60 = vadd.f32 %v344_v42, %v343_v36  ;;  %v186_v35 = vld [vmem:[%s1662_s1 + $0xf0] sm:$0xff]  ;;  %v247_v36 = vld [vmem:[%s1662_s1 + $0x2d8] sm:$0xff] }
  0x39   :  { %v416_v61 = vsel %vm146_vm1, %v214_v40, 0.0  ;;  %v522_v62 = vadd.f32 %v521_v45, %v520_v38  ;;  %v558_v63 = vsel %vm146_vm1, %v275_v41, 0.0  ;;  %v346_v3 = vsel %vm146_vm1, %v184_v46, 0.0  ;;  %v232_v41 = vld [vmem:[%s1662_s1 + $0x260] sm:$0xff]  ;;  %v202_v46 = vld [vmem:[%s1662_s1 + $0x170] sm:$0xff] }
  0x3a   :  { %v382_v4 = vadd.f32 %v381_v49, %v380_v43  ;;  %v487_v5 = vadd.f32 %v486_v51, %v485_v44  ;;  %v523_v6 = vsel %vm146_vm1, %v260_v47, 0.0  ;;  %v310_v9 = vadd.f32 %v309_v54, %v308_v48  ;;  %v217_v47 = vld [vmem:[%s1662_s1 + $0x1e8] sm:$0xff]  ;;  %v278_v48 = vld [vmem:[%s1662_s1 + $0x3d0] sm:$0xff] }
  0x3b   :  { %v383_v10 = vsel %vm146_vm1, %v200_v52, 0.0  ;;  %v452_v11 = vadd.f32 %v451_v56, %v450_v50  ;;  %v488_v12 = vsel %vm146_vm1, %v245_v53, 0.0  ;;  %v311_v14 = vsel %vm146_vm1, %v169_v58, 0.0  ;;  %v171_v52 = vld [vmem:[%s1662_s1 + $0x78] sm:$0xff] }
  0x3c   :  { %v417_v15 = vadd.f32 %v416_v61, %v415_v55  ;;  %v453_v16 = vsel %vm146_vm1, %v230_v59, 0.0  ;;  %v559_v17 = vadd.f32 %v558_v63, %v557_v57  ;;  %v418_v20 = vsel %vm146_vm1, %v215_v0, 0.0  ;;  %v263_v53 = vld [vmem:[%s1662_s1 + $0x358] sm:$0xff]  ;;  %v248_v59 = vld [vmem:[%s1662_s1 + $0x2e0] sm:$0xff]  ;;  %v233_v0 = vld [vmem:[%s1662_s1 + $0x268] sm:$0xff] }
  0x3d   :  { %v524_v21 = vadd.f32 %v523_v6, %v522_v62  ;;  %v560_v22 = vsel %vm146_vm1, %v276_v2, 0.0  ;;  %v347_v26 = vadd.f32 %v346_v3, %v345_v60  ;;  %v348_v27 = vsel %vm146_vm1, %v185_v7, 0.0  ;;  %v187_v58 = vld [vmem:[%s1662_s1 + $0xf8] sm:$0xff]  ;;  %v218_v6 = vld [vmem:[%s1662_s1 + $0x1f0] sm:$0xff] }
  0x3e   :  { %v489_v28 = vadd.f32 %v488_v12, %v487_v5  ;;  %v525_v29 = vsel %vm146_vm1, %v261_v8, 0.0  ;;  %v312_v31 = vadd.f32 %v311_v14, %v310_v9  ;;  %v384_v32 = vadd.f32 %v383_v10, %v382_v4  ;;  %v279_v7 = vld [vmem:[%s1662_s1 + $0x3d8] sm:$0xff] }
  0x3f   :  { %v454_v33 = vadd.f32 %v453_v16, %v452_v11  ;;  %v490_v34 = vsel %vm146_vm1, %v246_v13, 0.0  ;;  %v385_v37 = vsel %vm146_vm1, %v201_v18, 0.0  ;;  %v419_v38 = vadd.f32 %v418_v20, %v417_v15  ;;  %v203_v12 = vld [vmem:[%s1662_s1 + $0x178] sm:$0xff]  ;;  %v264_v13 = vld [vmem:[%s1662_s1 + $0x360] sm:$0xff] }
  0x40   :  { %v455_v39 = vsel %vm146_vm1, %v231_v19, 0.0  ;;  %v561_v40 = vadd.f32 %v560_v22, %v559_v17  ;;  %v313_v42 = vsel %vm146_vm1, %v170_v23, 0.0  ;;  %v420_v43 = vsel %vm146_vm1, %v216_v24, 0.0  ;;  %v249_v17 = vld [vmem:[%s1662_s1 + $0x2e8] sm:$0xff]  ;;  %v234_v22 = vld [vmem:[%s1662_s1 + $0x270] sm:$0xff] }
  0x41   :  { %v526_v44 = vadd.f32 %v525_v29, %v524_v21  ;;  %v562_v45 = vsel %vm146_vm1, %v277_v25, 0.0  ;;  %v349_v49 = vadd.f32 %v348_v27, %v347_v26  ;;  %v491_v50 = vadd.f32 %v490_v34, %v489_v28  ;;  %v219_v27 = vld [vmem:[%s1662_s1 + $0x1f8] sm:$0xff]  ;;  %v280_v28 = vld [vmem:[%s1662_s1 + $0x3e0] sm:$0xff] }
  0x42   :  { %v527_v51 = vsel %vm146_vm1, %v262_v30, 0.0  ;;  %v350_v54 = vsel %vm146_vm1, %v186_v35, 0.0  ;;  %v386_v55 = vadd.f32 %v385_v37, %v384_v32  ;;  %v456_v56 = vadd.f32 %v455_v39, %v454_v33  ;;  %v265_v33 = vld [vmem:[%s1662_s1 + $0x368] sm:$0xff] }
  0x43   :  { %v492_v57 = vsel %vm146_vm1, %v247_v36, 0.0  ;;  %v314_v60 = vadd.f32 %v313_v42, %v312_v31  ;;  %v421_v61 = vadd.f32 %v420_v43, %v419_v38  ;;  %v457_v62 = vsel %vm146_vm1, %v232_v41, 0.0  ;;  %v250_v36 = vld [vmem:[%s1662_s1 + $0x2f0] sm:$0xff] }
  0x44   :  { %v563_v63 = vadd.f32 %v562_v45, %v561_v40  ;;  %v387_v2 = vsel %vm146_vm1, %v202_v46, 0.0  ;;  %v422_v3 = vsel %vm146_vm1, %v217_v47, 0.0  ;;  %v528_v4 = vadd.f32 %v527_v51, %v526_v44  ;;  %v235_v40 = vld [vmem:[%s1662_s1 + $0x278] sm:$0xff]  ;;  %v281_v45 = vld [vmem:[%s1662_s1 + $0x3e8] sm:$0xff] }
  0x45   :  { %v564_v5 = vsel %vm146_vm1, %v278_v48, 0.0  ;;  %v315_v8 = vsel %vm146_vm1, %v171_v52, 0.0  ;;  %v351_v9 = vadd.f32 %v350_v54, %v349_v49  ;;  %v493_v10 = vadd.f32 %v492_v57, %v491_v50  ;;  %v266_v50 = vld [vmem:[%s1662_s1 + $0x370] sm:$0xff] }
  0x46   :  { %v529_v11 = vsel %vm146_vm1, %v263_v53, 0.0  ;;  %v352_v14 = vsel %vm146_vm1, %v187_v58, 0.0  ;;  %v458_v15 = vadd.f32 %v457_v62, %v456_v56  ;;  %v494_v16 = vsel %vm146_vm1, %v248_v59, 0.0  ;;  %v251_v53 = vld [vmem:[%s1662_s1 + $0x2f8] sm:$0xff] }
  0x47   :  { %v388_v18 = vadd.f32 %v387_v2, %v386_v55  ;;  %v423_v19 = vadd.f32 %v422_v3, %v421_v61  ;;  %v459_v20 = vsel %vm146_vm1, %v233_v0, 0.0  ;;  %v565_v21 = vadd.f32 %v564_v5, %v563_v63  ;;  %v267_v2 = vld [vmem:[%s1662_s1 + $0x378] sm:$0xff] }
  0x48   :  { %v316_v23 = vadd.f32 %v315_v8, %v314_v60  ;;  %v424_v24 = vsel %vm146_vm1, %v218_v6, 0.0  ;;  %v530_v25 = vadd.f32 %v529_v11, %v528_v4  ;;  %v566_v26 = vsel %vm146_vm1, %v279_v7, 0.0  ;;  %v282_v60 = vld [vmem:[%s1662_s1 + $0x3f0] sm:$0xff] }
  0x49   :  { %v353_v29 = vadd.f32 %v352_v14, %v351_v9  ;;  %v389_v30 = vsel %vm146_vm1, %v203_v12, 0.0  ;;  %v495_v31 = vadd.f32 %v494_v16, %v493_v10  ;;  %v531_v32 = vsel %vm146_vm1, %v264_v13, 0.0  ;;  %v283_v10 = vld [vmem:[%s1662_s1 + $0x3f8] sm:$0xff]  ;;  %s953_s1 = scalar_lea.vmem %s831_s0, 128 }
  0x4a   :  { %v460_v34 = vadd.f32 %v459_v20, %v458_v15  ;;  %v496_v35 = vsel %vm146_vm1, %v249_v17, 0.0  ;;  %v425_v37 = vadd.f32 %v424_v24, %v423_v19  ;;  %v461_v38 = vsel %vm146_vm1, %v234_v22, 0.0  ;;  %p954_p0 = scmp.ne.s32.totalorder %s831_s0, %s953_s1  ;;  %p959_p2 = scmp.lt.s32.totalorder %s953_s1, %s953_s1 }
  0x4b   :  { %v567_v39 = vadd.f32 %v566_v26, %v565_v21  ;;  %v390_v41 = vadd.f32 %v389_v30, %v388_v18  ;;  %v426_v42 = vsel %vm146_vm1, %v219_v27, 0.0  ;;  %v532_v43 = vadd.f32 %v531_v32, %v530_v25 }
  0x4c   :  { %v568_v44 = vsel %vm146_vm1, %v280_v28, 0.0  ;;  %v317_v46 = vrot.slane %v316_v23, 4  ;;  %v354_v47 = vrot.slane %v353_v29, 4  ;;  %v497_v48 = vadd.f32 %v496_v35, %v495_v31  ;;  %p960_p3 = por %p959_p2, %p958_p1 }
  0x4d   :  { %v533_v49 = vsel %vm146_vm1, %v265_v33, 0.0  ;;  %v462_v51 = vadd.f32 %v461_v38, %v460_v34  ;;  %v498_v52 = vsel %vm146_vm1, %v250_v36, 0.0  ;;  %v427_v54 = vadd.f32 %v426_v42, %v425_v37 }
  0x4e   :  { %v463_v55 = vsel %vm146_vm1, %v235_v40, 0.0  ;;  %v569_v56 = vadd.f32 %v568_v44, %v567_v39  ;;  %v391_v57 = vrot.slane %v390_v41, 4  ;;  %v534_v58 = vadd.f32 %v533_v49, %v532_v43  ;;  %p961_p4 = pnand %p960_p3, %p954_p0 }
  0x4f   :  { %v570_v59 = vsel %vm146_vm1, %v281_v45, 0.0  ;;  %v318_v61 = vadd.f32 %v317_v46, %v316_v23  ;;  %v355_v62 = vadd.f32 %v354_v47, %v353_v29  ;;  %v499_v63 = vadd.f32 %v498_v52, %v497_v48 }
  0x50   :  { %v535_v0 = vsel %vm146_vm1, %v266_v50, 0.0  ;;  %v464_v3 = vadd.f32 %v463_v55, %v462_v51  ;;  %v500_v4 = vsel %vm146_vm1, %v251_v53, 0.0  ;;  %v428_v5 = vrot.slane %v427_v54, 4 }
  0x51   :  { %v571_v6 = vadd.f32 %v570_v59, %v569_v56  ;;  %v392_v7 = vadd.f32 %v391_v57, %v390_v41  ;;  %v536_v8 = vadd.f32 %v535_v0, %v534_v58  ;;  %v572_v9 = vsel %vm146_vm1, %v282_v60, 0.0 }
  0x52   :  { %v319_v11 = vrot.slane %v318_v61, 2  ;;  %v356_v12 = vrot.slane %v355_v62, 2  ;;  %v501_v13 = vadd.f32 %v500_v4, %v499_v63  ;;  %v537_v14 = vsel %vm146_vm1, %v267_v2, 0.0 }
  0x53   :  { %v465_v15 = vrot.slane %v464_v3, 4  ;;  %v429_v16 = vadd.f32 %v428_v5, %v427_v54  ;;  %v573_v17 = vadd.f32 %v572_v9, %v571_v6  ;;  %v393_v18 = vrot.slane %v392_v7, 2  ;;  %v943_v9 = vld [vmem:[%s1667_s6] sm:$0xff]  }
  0x54   :  { %v538_v19 = vadd.f32 %v537_v14, %v536_v8  ;;  %v574_v20 = vsel %vm146_vm1, %v283_v10, 0.0  ;;  %v320_v21 = vadd.f32 %v319_v11, %v318_v61  ;;  %v357_v22 = vadd.f32 %v356_v12, %v355_v62  ;;  %v944_v11 = vld [vmem:[%s1667_s6 + $0x8] sm:$0xff]   ;;  %v945_v12 = vld [vmem:[%s1667_s6 + $0x10] sm:$0xff]   ;;  %v947_v14 = vld [vmem:[%s1667_s6 + $0x20] sm:$0xff]  }
  0x55   :  { %v502_v23 = vrot.slane %v501_v13, 4  ;;  %v466_v24 = vadd.f32 %v465_v15, %v464_v3  ;;  %v430_v25 = vrot.slane %v429_v16, 2  ;;  %v575_v26 = vadd.f32 %v574_v20, %v573_v17  ;;  %v948_v15 = vld [vmem:[%s1667_s6 + $0x28] sm:$0xff]   ;;  %v950_v17 = vld [vmem:[%s1667_s6 + $0x38] sm:$0xff]  }
  0x56   :  { %v394_v27 = vadd.f32 %v393_v18, %v392_v7  ;;  %v539_v28 = vrot.slane %v538_v19, 4  ;;  %v321_v29 = vrot.slane %v320_v21, 1  ;;  %v358_v30 = vrot.slane %v357_v22, 1  ;;  %v846_v18 = vld [vmem:[%s1666_s5] ss:$0 sm:$0xff] }
  0x57   :  { %v503_v31 = vadd.f32 %v502_v23, %v501_v13  ;;  %v467_v32 = vrot.slane %v466_v24, 2  ;;  %v431_v33 = vadd.f32 %v430_v25, %v429_v16  ;;  %v576_v34 = vrot.slane %v575_v26, 4  ;;  %v946_v13 = vld [vmem:[%s1667_s6 + $0x18] sm:$0xff]   ;;  %v949_v16 = vld [vmem:[%s1667_s6 + $0x30] sm:$0xff]  }
  0x58   :  { %v395_v35 = vrot.slane %v394_v27, 1  ;;  %v540_v36 = vadd.f32 %v539_v28, %v538_v19  ;;  %v322_v37 = vadd.f32 %v321_v29, %v320_v21  ;;  %v359_v38 = vadd.f32 %v358_v30, %v357_v22 }
  0x59   :  { %v504_v39 = vrot.slane %v503_v31, 2  ;;  %v468_v40 = vadd.f32 %v467_v32, %v466_v24  ;;  %v432_v41 = vrot.slane %v431_v33, 1  ;;  %v577_v42 = vadd.f32 %v576_v34, %v575_v26 }
  0x5a   :  { %v396_v43 = vadd.f32 %v395_v35, %v394_v27  ;;  %v541_v44 = vrot.slane %v540_v36, 2  ;;  %v591_v46 = vsel %vm590_vm2, %v359_v38, %v322_v37  ;;  %v791_v27 = vld [vmem:[%s1664_s3] sm:$0xff] }
  0x5b   :  { %v505_v45 = vadd.f32 %v504_v39, %v503_v31  ;;  %v469_v47 = vrot.slane %v468_v40, 1  ;;  %v433_v48 = vadd.f32 %v432_v41, %v431_v33  ;;  %v578_v49 = vrot.slane %v577_v42, 2 }
  0x5c   :  { %v542_v50 = vadd.f32 %v541_v44, %v540_v36  ;;  %v593_v51 = vsel %vm592_vm3, %v396_v43, %v591_v46  ;;  %v859_v43 = vld [vmem:[%s1669_s8] ss:$0 sm:$0xff] }
  0x5d   :  { %v506_v52 = vrot.slane %v505_v45, 1  ;;  %v470_v53 = vadd.f32 %v469_v47, %v468_v40  ;;  %v579_v54 = vadd.f32 %v578_v49, %v577_v42  ;;  %v595_v55 = vsel %vm594_vm4, %v433_v48, %v593_v51 }
  0x5e   :  { %v543_v56 = vrot.slane %v542_v50, 1 }
  0x5f   :  { %v507_v57 = vadd.f32 %v506_v52, %v505_v45  ;;  %v597_v58 = vsel %vm596_vm5, %v470_v53, %v595_v55  ;;  %v580_v59 = vrot.slane %v579_v54, 1  ;;  %v860_v45 = vld [vmem:[%s1670_s9] ss:$0 sm:$0xff] }
  0x60   :  { %v544_v60 = vadd.f32 %v543_v56, %v542_v50 }
  0x61   :  { %v599_v62 = vsel %vm598_vm6, %v507_v57, %v597_v58  ;;  %v581_v0 = vadd.f32 %v580_v59, %v579_v54 }
  0x62   :  { %v601_v3 = vsel %vm600_vm7, %v544_v60, %v599_v62 }
  0x63   :  { %v603_v5 = vsel %vm602_vm8, %v581_v0, %v601_v3 }
  0xf4   :  { %v136_v61 = vpop.f32.mrb[0].mxu0 }
  0xf5   :  { %147 = vst.msk [vmem:[#allocation2] sm:$0xff] %vm146_vm1, %v136_v61  ;;  %v900_v63 = vpop.f32.mrb[1].mxu0 }
  0xf6   :  { %v139_v2 = vpop.f32.mrb[2].mxu0 }
  0xf7   :  { %v901_v4 = vpop.f32.mrb[3].mxu0 }
  0xfc   :  { %v284_v6 = vld [vmem:[#allocation2] sm:$0xff] }
  0xfd   :  { %v605_v7 = vadd.f32 %v603_v5, %v284_v6 }
  0xff   :  { %606 = vst.msk [vmem:[#allocation2] sm:$0xff] %vm146_vm1, %v605_v7 }
 0x106   :  { %v610_v8 = vld [vmem:[#allocation2] sm:$0xff] }
 0x107   :  { %v611_v10 = vpack.c.bf16 %v610_v8, %v610_v8 }
 0x109   :  { %907 = vmatmul.mubr.msk.bf16.vlgmr.msra.gmra.mrb[0].mxu1 %vm146_vm1, %v611_v10 }
 0x10a   :  { %911 = vmatpush3.bf16.msra.mxu1 %v943_v9  ;;  %926 = vmatprep.mubr.msk.bf16.mxu1 %vm978_vm0, %v977_v1 }
 0x10b   :  { %912 = vmatprep.subr.bf16.mxu1 %v977_v1 }
 0x10e   :  { %913 = vmatpush3.bf16.msra.mxu1 %v944_v11 }
 0x10f   :  { %914 = vmatprep.subr.bf16.mxu1 %v977_v1 }
 0x112   :  { %915 = vmatpush3.bf16.msra.mxu1 %v945_v12 }
 0x113   :  { %916 = vmatprep.subr.bf16.mxu1 %v977_v1 }
 0x116   :  { %917 = vmatpush3.bf16.msra.mxu1 %v946_v13 }
 0x117   :  { %918 = vmatprep.subr.bf16.mxu1 %v977_v1 }
 0x11a   :  { %919 = vmatpush3.bf16.msra.mxu1 %v947_v14 }
 0x11b   :  { %920 = vmatprep.subr.bf16.mxu1 %v977_v1 }
 0x11e   :  { %921 = vmatpush3.bf16.msra.mxu1 %v948_v15 }
 0x11f   :  { %922 = vmatprep.subr.bf16.mxu1 %v977_v1 }
 0x122   :  { %923 = vmatpush3.bf16.msra.mxu1 %v949_v16 }
 0x123   :  { %924 = vmatprep.subr.bf16.mxu1 %v977_v1  ;;  %v850_v1 = vld [vmem:[%s1668_s7] ss:$0 sm:$0xff] }
 0x126   :  { %925 = vmatpush3.bf16.msra.mxu1 %v950_v17 }
 0x1dc   :  { %v672_v19 = vpop.f32.mrb[0].mxu1 }
 0x1dd   :  { %v673_v20 = vadd.f32 %v846_v18, %v672_v19  ;;  %v908_v21 = vpop.f32.mrb[1].mxu1 }
 0x1de   :  { %v675_v22 = vpop.f32.mrb[2].mxu1 }
 0x1df   :  { %v678_v23 = vmax.f32 %v673_v20, 0.0  ;;  %v909_v24 = vpop.f32.mrb[3].mxu1 }
 0x1e1   :  { %v679_v25 = vpack.c.bf16 %v678_v23, %v678_v23 }
 0x1e3   :  { %927 = vmatmul.mubr.bf16.vlgmr.msra.gmra.mrb[4].mxu1 %v679_v25 }
 0x2b6   :  { %v785_v26 = vpop.f32.mrb[4].mxu1 }
 0x2b7   :  { %v786_v28 = vadd.f32 %v850_v1, %v785_v26  ;;  %v928_v29 = vpop.f32.mrb[5].mxu1 }
 0x2b8   :  { %v788_v30 = vpop.f32.mrb[6].mxu1 }
 0x2b9   :  { %v929_v31 = vpop.f32.mrb[7].mxu1  ;;  %v792_v32 = vadd.f32 %v791_v27, %v786_v28 }
 0x2bb   :  { %v793_v33 = vsel %vm146_vm1, %v792_v32, 0.0 }
 0x2bc   :  { %794 = vadd.xlane.f32.xlu0 %v793_v33 }
 0x349   :  { %v795_v34 = vpop.xlane.xlu0 %794 }
 0x34a   :  { %v797_v35 = vmul.f32 0.03125, %v795_v34 }
 0x34c   :  { %v798_v36 = vsub.f32 %v792_v32, %v797_v35 }
 0x34e   :  { %v799_v37 = vmul.f32 %v798_v36, %v798_v36 }
 0x350   :  { %v800_v38 = vsel %vm146_vm1, %v799_v37, 0.0 }
 0x351   :  { %801 = vadd.xlane.f32.xlu0 %v800_v38 }
 0x3de   :  { %v802_v39 = vpop.xlane.xlu0 %801 }
 0x3df   :  { %v803_v40 = vmul.f32 0.03125, %v802_v39 }
 0x3e1   :  { %v804_v41 = vadd.f32 1e-05, %v803_v40 }
 0x3e3   :  { %951 = vrsqrt.f32 %v804_v41 }
 0x3ed   :  { %v952_v42 = vpop.eup %951 }
 0x3ee   :  { %v806_v44 = vmul.f32 %v952_v42, %v798_v36 }
 0x3f0   :  { %v814_v46 = vmul.f32 %v859_v43, %v806_v44 }
 0x3f2   :  { %v822_v47 = vadd.f32 %v860_v45, %v814_v46 }
 0x3f4   :  { %823 = vst.msk [vmem:[#allocation3] sm:$0xff] %vm146_vm1, %v822_v47 }
 0x3f5   :  { %964 = shalt.err (!%p961_p4)
}
 0x3f6   :  { %s965_s17 = scalar_lea.hbm %s1671_s10, 128 }
 0x3f7   :  { %p966_p5 = scmp.ne.s32.totalorder %s1671_s10, %s965_s17  ;;  %p969_p6 = scmp.lt.u32.totalorder %s965_s17, %s1671_s10 }
 0x3f9   :  { %p971_p7 = pnand %p969_p6, %p966_p5 }
 0x3fb   :  { %974 = shalt.err (!%p971_p7)
}
 0x3fc   :  { %833 = dma.vmem_to_hbm [thread:$0]  %s831_s0, 128, %s1671_s10, [#allocation4]  }
 0x3fd   :  { %975 = dma.done.wait [#allocation4], 128  }
 0x3fe   :  { %976 = vsyncadd [#allocation4], 4294967168 }
 0x3ff   :  { %837 = vsyncpa [#allocation4], 1 }

</bundles_post_ra>
